<compile_context>
chip_gen: v6e
topology: v6e:2x2x1
jax: 0.10.0
libtpu: 0.0.40
codegen_flags: <defaults>
</compile_context>

<pallas_src>
import jax
import jax.numpy as jnp
import numpy as np
from jax.experimental import pallas as pl
from jax.experimental.pallas import tpu as pltpu


def _make_kernel(n_total, tile_n):
    """Build the fused kernel; `ragged` masking is only traced when needed."""
    ragged = (n_total % tile_n) != 0

    def kernel(x_ref, mask_ref,
               w0_ref, b0_ref,
               whg_ref, bhg_ref,
               ww_ref,
               out_ref,
               m_ref, l_ref, acc_ref):
        # Scratch (persists across the j axis for a given slide b):
        #   m_ref   (1, 1)  running max of masked attention logits
        #   l_ref   (1, 1)  running softmax denominator
        #   acc_ref (1, D)  running un-normalized attention-weighted sum of tile embeddings
        j = pl.program_id(1)
        neg_inf = jnp.float32(-jnp.inf)

        @pl.when(j == 0)
        def _init():
            m_ref[...] = jnp.full_like(m_ref, -jnp.inf)
            l_ref[...] = jnp.zeros_like(l_ref)
            acc_ref[...] = jnp.zeros_like(acc_ref)

        x = x_ref[0]          # (tN, 3+Fin) bf16 -- coords included; zero rows of W0 drop them
        msk = mask_ref[0]     # (tN, 1)     f32, >0 = padded tile

        # --- TilesMLP (hidden=None): E = x @ W0_aug + b0 ; bf16 operands, f32 accumulation ---
        e = jnp.dot(x, w0_ref[...], preferred_element_type=jnp.float32) + b0_ref[...]   # (tN, D)

        # --- GatedAttention: fused Wa|Wg projection, tanh/sigmoid in f32 ---
        z = jnp.dot(e.astype(jnp.bfloat16), whg_ref[...],
                    preferred_element_type=jnp.float32) + bhg_ref[...]                  # (tN, 2D)
        d = z.shape[-1] // 2
        h = jnp.tanh(z[:, :d])
        u = jax.nn.sigmoid(z[:, d:])
        # VPU row-dot against the ww row instead of a 1-column MXU matmul.
        # bw omitted on purpose: softmax over tiles is shift-invariant.
        logit = jnp.sum((h * u) * ww_ref[...], axis=-1, keepdims=True)                  # (tN, 1)

        # Row validity: user mask (True/1.0 = padded) and, for a ragged last block,
        # rows past N (their VMEM contents are unspecified and must not contribute).
        valid = msk <= 0.0                                                              # (tN, 1)
        if ragged:
            row = j * tile_n + jax.lax.broadcasted_iota(jnp.int32, (tile_n, 1), 0)
            valid = jnp.logical_and(valid, row < n_total)
        logit = jnp.where(valid, logit, neg_inf)                                        # masked_fill

        # --- online softmax over the tiles axis ---
        m_old = m_ref[...]                                                              # (1, 1)
        m_new = jnp.maximum(m_old, jnp.max(logit, axis=0, keepdims=True))
        # If every tile seen so far is masked, m_new == -inf; substitute 0 so the exp()
        # terms stay 0 instead of NaN. (A fully-masked slide still yields NaN at the final
        # normalization, matching PyTorch softmax-of-all(-inf).)
        m_safe = jnp.where(m_new == neg_inf, jnp.float32(0.0), m_new)
        scale = jnp.exp(m_old - m_safe)                                                 # (1, 1)
        p = jnp.exp(logit - m_safe)                                                     # (tN, 1)
        # Zero invalid rows of E so garbage in out-of-range / padded rows cannot leak
        # through zero-weight contributions (0 * NaN guard).
        e_valid = jnp.where(valid, e, jnp.float32(0.0))                                 # (tN, D)

        l_ref[...] = scale * l_ref[...] + jnp.sum(p, axis=0, keepdims=True)
        # Attention-weighted embeddings on the MXU, f32 operands (memory-bound kernel,
        # the extra MXU passes are free and keep full fidelity).
        contrib = jax.lax.dot_general(
            p, e_valid,
            dimension_numbers=(((0,), (0,)), ((), ())),
            preferred_element_type=jnp.float32)                                         # (1, D)
        acc_ref[...] = scale * acc_ref[...] + contrib
        m_ref[...] = m_new

        # --- finalize: normalized attention-weighted embedding for this slide ---
        @pl.when(j == pl.num_programs(1) - 1)
        def _finalize():
            out_ref[0] = (acc_ref[...] / l_ref[...]).astype(out_ref.dtype)              # (1, D)

    return kernel


def _prep_weights(params):
    """Fold the coordinate drop into W0, fuse Wa|Wg, cast matmul weights to bf16."""
    bf = jnp.bfloat16
    w0 = params["w0"]
    d = w0.shape[1]
    w0_aug = jnp.concatenate([jnp.zeros((3, d), w0.dtype), w0], axis=0).astype(bf)
    whg = jnp.concatenate([params["wa"], params["wg"]], axis=1).astype(bf)
    bhg = jnp.concatenate([params["ba"], params["bg"]], axis=1).astype(jnp.float32)
    ww_row = params["ww"].reshape(1, -1).astype(jnp.float32)     # (1, D) row for the VPU dot
    return w0_aug, params["b0"].astype(jnp.float32), whg, bhg, ww_row


def _vmem_capacity_bytes():
    try:
        info = pltpu.get_tpu_info()
        cap = getattr(info, "vmem_capacity_bytes", None)
        if cap:
            return int(cap)
    except Exception:
        pass
    return 64 << 20      # conservative fallback (v7x per-core VMEM)


def _budgets():
    cap_phys = _vmem_capacity_bytes()
    if cap_phys >= (100 << 20):
        # v5e / v6e: 128 MiB physical VMEM -> big tiles, generous scoped limit.
        x_budget, vmem_cap = (12 << 20), (96 << 20)
    else:
        # v7x: 64 MiB physical -> leave headroom for compiler scratch / spills.
        x_budget, vmem_cap = (5 << 20), (52 << 20)
    vmem_cap = min(vmem_cap, int(cap_phys * 0.82))
    return x_budget, vmem_cap


def _choose_tile_n(n, f3, x_budget_bytes):
    # Big enough to amortize ~0.35 us/step pipeline overhead and hit the HBM roofline,
    # small enough that double-buffered bf16 x tiles + f32 intermediates fit the budget.
    rows = x_budget_bytes // (f3 * 2)                 # x streamed as bf16
    rows = max(16, min(4096, (rows // 16) * 16))      # multiple of 16 for bf16 sublane packing
    return n if n <= rows else rows


def _vmem_limit_bytes(tile_n, f3, d, cap):
    f32, bf16 = 4, 2
    x_tile = tile_n * f3 * bf16
    mask_tile = tile_n * 128 * f32                    # (tN,1) block pads to 128 lanes
    weights = f3 * d * bf16 + 2 * d * d * bf16        # W0_aug, Wa|Wg (no Wm: head is outside)
    biases = (3 * d + 2 * 128) * f32
    inter = tile_n * (8 * d + 2 * 128) * f32          # e/z/h/u/h*u/e_valid/p live set (rough)
    est = 2 * (x_tile + mask_tile) + 2 * (weights + biases) + inter + (6 << 20)
    return int(min(max(est, 32 << 20), cap))


def he2rna_forward(x, mask, params, *, tile_n=None):
    """x: (B, N, 3 + Fin) float32 or bfloat16; mask: (B, N, 1) bool (True = padded tile)."""
    B, N, F3 = x.shape
    D = params["w0"].shape[1]

    # Stream x in bf16: halves HBM bytes of the dominant input (kernel is HBM-bound).
    # TODO(synk): have callers store tile features in bf16 so this cast disappears.
    if x.dtype != jnp.bfloat16:
        x = x.astype(jnp.bfloat16)
    mask_f = mask.astype(jnp.float32)

    w0_aug, b0, whg, bhg, ww_row = _prep_weights(params)

    x_budget, vmem_cap = _budgets()
    if tile_n is None:
        tile_n = _choose_tile_n(N, F3, x_budget)
    tile_n = int(max(1, min(tile_n, N)))
    if tile_n < N:
        tile_n = max(16, (tile_n // 16) * 16)
    # Ragged N: no HBM pad of x; grid = cdiv and the last partial block is masked in-kernel.
    n_steps = (N + tile_n - 1) // tile_n

    const = lambda b, j: (0, 0)
    grid_spec = pltpu.PrefetchScalarGridSpec(
        num_scalar_prefetch=0,
        grid=(B, n_steps),
        in_specs=[
            pl.BlockSpec((1, tile_n, F3), lambda b, j: (b, j, 0)),   # x tile (bf16)
            pl.BlockSpec((1, tile_n, 1), lambda b, j: (b, j, 0)),    # mask tile
            pl.BlockSpec((F3, D), const),                            # W0 (coords folded in)
            pl.BlockSpec((1, D), const),                             # b0
            pl.BlockSpec((D, 2 * D), const),                         # Wa|Wg fused
            pl.BlockSpec((1, 2 * D), const),                         # ba|bg fused
            pl.BlockSpec((1, D), const),                             # Ww as a row (VPU dot)
        ],
        out_specs=pl.BlockSpec((1, 1, D), lambda b, j: (b, 0, 0)),
        scratch_shapes=[
            pltpu.VMEM((1, 1), jnp.float32),    # running max
            pltpu.VMEM((1, 1), jnp.float32),    # running denominator
            pltpu.VMEM((1, D), jnp.float32),    # running attn-weighted E
        ],
    )
    scaled = pl.pallas_call(
        _make_kernel(N, tile_n),
        out_shape=jax.ShapeDtypeStruct((B, 1, D), jnp.float32),
        grid_spec=grid_spec,
        compiler_params=pltpu.CompilerParams(
            dimension_semantics=("parallel", "arbitrary"),
            vmem_limit_bytes=_vmem_limit_bytes(tile_n, F3, D, vmem_cap)),
    )(x, mask_f, w0_aug, b0, whg, bhg, ww_row)

    # MLP head outside the kernel: (B, D) @ (D, OUT) is tiny and keeps Wm out of VMEM.
    scaled = scaled[:, 0, :]
    return scaled @ params["wm"].astype(jnp.float32) + params["bm"].astype(jnp.float32)


def he2rna_reference_f32(x, mask, params):
    """Pure-f32 reference with the original module semantics (bw included)."""
    xf = x[..., 3:]
    e = xf @ params["w0"] + params["b0"]
    h = jnp.tanh(e @ params["wa"] + params["ba"])
    u = jax.nn.sigmoid(e @ params["wg"] + params["bg"])
    logit = (h * u) @ params["ww"] + params["bw"]
    logit = jnp.where(mask, -jnp.inf, logit)
    attn = jax.nn.softmax(logit, axis=1)
    scaled = jnp.sum(attn * e, axis=1)
    return scaled @ params["wm"] + params["bm"]


def he2rna_reference_mixed(x, mask, params):
    """Reference mirroring the kernel's bf16-operand / f32-accumulation math (untiled)."""
    bf = jnp.bfloat16
    f32 = jnp.float32
    d = params["w0"].shape[1]
    xf = x[..., 3:].astype(bf)
    e = jnp.einsum("bnf,fd->bnd", xf, params["w0"].astype(bf),
                   preferred_element_type=f32) + params["b0"]
    whg = jnp.concatenate([params["wa"], params["wg"]], axis=1).astype(bf)
    bhg = jnp.concatenate([params["ba"], params["bg"]], axis=1)
    z = jnp.einsum("bnd,de->bne", e.astype(bf), whg, preferred_element_type=f32) + bhg
    h = jnp.tanh(z[..., :d])
    u = jax.nn.sigmoid(z[..., d:])
    ww_row = params["ww"].reshape(1, 1, -1)
    logit = jnp.sum((h * u) * ww_row, axis=-1, keepdims=True)   # bw omitted (shift-invariant)
    logit = jnp.where(mask, -jnp.inf, logit)
    m = jnp.max(logit, axis=1, keepdims=True)
    m_safe = jnp.where(jnp.isfinite(m), m, 0.0)
    p = jnp.exp(logit - m_safe)
    l = jnp.sum(p, axis=1, keepdims=True)
    e_valid = jnp.where(mask, 0.0, e)
    scaled = jnp.einsum("bno,bnd->bod", p, e_valid)[:, 0, :] / l[:, 0, :]
    return scaled @ params["wm"] + params["bm"]


def init_params(key, in_features, d_model, out_features):
    ks = jax.random.split(key, 5)

    def lin(k, fi, fo):
        bound = 1.0 / np.sqrt(fi)
        kw, kb = jax.random.split(k)
        w = jax.random.uniform(kw, (fi, fo), jnp.float32, -bound, bound)
        b = jax.random.uniform(kb, (1, fo), jnp.float32, -bound, bound)
        return w, b

    w0, b0 = lin(ks[0], in_features, d_model)   # TilesMLP out layer
    wa, ba = lin(ks[1], d_model, d_model)       # attention "att"
    wg, bg = lin(ks[2], d_model, d_model)       # attention "gate"
    ww, bw = lin(ks[3], d_model, 1)             # attention "w" (MaskedLinear)
    wm, bm = lin(ks[4], d_model, out_features)  # MLP head
    return dict(w0=w0, b0=b0, wa=wa, ba=ba, wg=wg, bg=bg, ww=ww, bw=bw, wm=wm, bm=bm)


if __name__ == "__main__":
    # Small shapes consistent with the module (post coordinate drop):
    #   in_features=32, d_model_attention=32, out_features=16, 40 tiles per slide.
    # N=40 with TILE_N=16 -> 3 N-steps, the last one ragged (8 valid rows): exercises the
    # online-softmax accumulation AND the no-pad boundary-block masking path.
    B, N = 2, 40
    IN_FEATURES, D_MODEL, OUT_FEATURES = 32, 32, 16
    TILE_N = 16

    key = jax.random.PRNGKey(0)
    k_x, k_p = jax.random.split(key)
    x = jax.random.normal(k_x, (B, N, 3 + IN_FEATURES), jnp.float32)
    # mask: True = padded tile. Slide 0 has its FIRST tile block fully padded (exercises
    # the running-max -inf guard); slide 1 has its tail (incl. the ragged block) padded.
    mask = jnp.zeros((B, N, 1), dtype=bool)
    mask = mask.at[0, :TILE_N, 0].set(True)
    mask = mask.at[1, 24:, 0].set(True)

    params = init_params(k_p, IN_FEATURES, D_MODEL, OUT_FEATURES)

    logits = he2rna_forward(x, mask, params, tile_n=TILE_N)
    jax.block_until_ready(logits)

    # Tight check vs a reference that applies the same bf16-operand / f32-accum casts.
    ref_mixed = he2rna_reference_mixed(x, mask, params)
    np.testing.assert_allclose(np.asarray(logits), np.asarray(ref_mixed),
                               rtol=1e-2, atol=1e-2)
    # Looser sanity check vs the pure-f32 module semantics (bound on bf16 rounding of x/E).
    ref_f32 = he2rna_reference_f32(x, mask, params)
    np.testing.assert_allclose(np.asarray(logits), np.asarray(ref_f32),
                               rtol=1e-1, atol=1e-1)

    print("KERNEL_OK")
</pallas_src>

<mosaic_0001>
module attributes {stable_mosaic.version = 11 : i64} {
  func.func @kernel(%arg0: i32, %arg1: i32, %arg2: memref<1x16x35xbf16, #tpu.memory_space<vmem>>, %arg3: memref<1x16x1xf32, #tpu.memory_space<vmem>>, %arg4: memref<35x32xbf16, #tpu.memory_space<vmem>>, %arg5: memref<1x32xf32, #tpu.memory_space<vmem>>, %arg6: memref<32x64xbf16, #tpu.memory_space<vmem>>, %arg7: memref<1x64xf32, #tpu.memory_space<vmem>>, %arg8: memref<1x32xf32, #tpu.memory_space<vmem>>, %arg9: memref<1x1x32xf32, #tpu.memory_space<vmem>>, %arg10: memref<1x1xf32, #tpu.memory_space<vmem>>, %arg11: memref<1x1xf32, #tpu.memory_space<vmem>>, %arg12: memref<1x32xf32, #tpu.memory_space<vmem>>) attributes {dimension_semantics = [#tpu.dimension_semantics<parallel>, #tpu.dimension_semantics<arbitrary>], iteration_bounds = array<i64: 2, 3>, scalar_prefetch = 0 : i64, scratch_operands = 3 : i64, tpu.core_type = #tpu.core_type<tc>, window_params = [{transform_indices = @transform_0, window_bounds = array<i64: 1, 16, 35>}, {transform_indices = @transform_1, window_bounds = array<i64: 1, 16, 1>}, {pipeline_mode = #tpu.pipeline_mode<synchronous>, transform_indices = @transform_2, window_bounds = array<i64: 35, 32>}, {pipeline_mode = #tpu.pipeline_mode<synchronous>, transform_indices = @transform_3, window_bounds = array<i64: 1, 32>}, {pipeline_mode = #tpu.pipeline_mode<synchronous>, transform_indices = @transform_4, window_bounds = array<i64: 32, 64>}, {pipeline_mode = #tpu.pipeline_mode<synchronous>, transform_indices = @transform_5, window_bounds = array<i64: 1, 64>}, {pipeline_mode = #tpu.pipeline_mode<synchronous>, transform_indices = @transform_6, window_bounds = array<i64: 1, 32>}, {transform_indices = @transform_7, window_bounds = array<i64: 1, 1, 32>}]} {
    %c0_i32 = arith.constant 0 : i32
    %0 = arith.cmpi eq, %arg1, %c0_i32 : i32
    %1 = arith.extui %0 : i1 to i32
    %c0_i32_0 = arith.constant 0 : i32
    %2 = arith.cmpi ne, %1, %c0_i32_0 : i32
    scf.if %2 {
      %cst_40 = arith.constant 0xFF800000 : f32
      %76 = vector.broadcast %cst_40 : f32 to vector<1x1xf32>
      %c0_41 = arith.constant 0 : index
      %c0_42 = arith.constant 0 : index
      %77 = vector.load %arg10[%c0_41, %c0_42] : memref<1x1xf32, #tpu.memory_space<vmem>>, vector<1x1xf32>
      tpu.vector_store %arg10[%c0_41, %c0_42], %76 {strides = array<i32>} : memref<1x1xf32, #tpu.memory_space<vmem>>, vector<1x1xf32>,
      %cst_43 = arith.constant 0.000000e+00 : f32
      %78 = vector.broadcast %cst_43 : f32 to vector<1x1xf32>
      %c0_44 = arith.constant 0 : index
      %c0_45 = arith.constant 0 : index
      %79 = vector.load %arg11[%c0_44, %c0_45] : memref<1x1xf32, #tpu.memory_space<vmem>>, vector<1x1xf32>
      tpu.vector_store %arg11[%c0_44, %c0_45], %78 {strides = array<i32>} : memref<1x1xf32, #tpu.memory_space<vmem>>, vector<1x1xf32>,
      %cst_46 = arith.constant 0.000000e+00 : f32
      %80 = vector.broadcast %cst_46 : f32 to vector<1x32xf32>
      %c0_47 = arith.constant 0 : index
      %c0_48 = arith.constant 0 : index
      %81 = vector.load %arg12[%c0_47, %c0_48] : memref<1x32xf32, #tpu.memory_space<vmem>>, vector<1x32xf32>
      tpu.vector_store %arg12[%c0_47, %c0_48], %80 {strides = array<i32>} : memref<1x32xf32, #tpu.memory_space<vmem>>, vector<1x32xf32>,
    } else {
    }
    %c0 = arith.constant 0 : index
    %c0_1 = arith.constant 0 : index
    %c0_2 = arith.constant 0 : index
    %3 = vector.load %arg2[%c0, %c0_1, %c0_2] : memref<1x16x35xbf16, #tpu.memory_space<vmem>>, vector<1x16x35xbf16>
    %4 = vector.shape_cast %3 : vector<1x16x35xbf16> to vector<16x35xbf16>
    %c0_3 = arith.constant 0 : index
    %c0_4 = arith.constant 0 : index
    %c0_5 = arith.constant 0 : index
    %5 = vector.load %arg3[%c0_3, %c0_4, %c0_5] : memref<1x16x1xf32, #tpu.memory_space<vmem>>, vector<1x16x1xf32>
    %6 = vector.shape_cast %5 : vector<1x16x1xf32> to vector<16x1xf32>
    %c0_6 = arith.constant 0 : index
    %c0_7 = arith.constant 0 : index
    %7 = vector.load %arg4[%c0_6, %c0_7] : memref<35x32xbf16, #tpu.memory_space<vmem>>, vector<35x32xbf16>
    %cst = arith.constant dense<0.000000e+00> : vector<16x32xf32>
    %8 = tpu.matmul %4, %7, %cst {dimension_numbers = #tpu.dot_dimension_numbers<[1], [0], [0], [1], [0, 0, 1, 1], [], []>} : vector<16x35xbf16>, vector<35x32xbf16>, vector<16x32xf32> -> vector<16x32xf32>
    %c0_8 = arith.constant 0 : index
    %c0_9 = arith.constant 0 : index
    %9 = vector.load %arg5[%c0_8, %c0_9] : memref<1x32xf32, #tpu.memory_space<vmem>>, vector<1x32xf32>
    %10 = vector.broadcast %9 : vector<1x32xf32> to vector<16x32xf32>
    %11 = arith.addf %8, %10 : vector<16x32xf32>
    %12 = arith.truncf %11 : vector<16x32xf32> to vector<16x32xbf16>
    %c0_10 = arith.constant 0 : index
    %c0_11 = arith.constant 0 : index
    %13 = vector.load %arg6[%c0_10, %c0_11] : memref<32x64xbf16, #tpu.memory_space<vmem>>, vector<32x64xbf16>
    %cst_12 = arith.constant dense<0.000000e+00> : vector<16x64xf32>
    %14 = tpu.matmul %12, %13, %cst_12 {dimension_numbers = #tpu.dot_dimension_numbers<[1], [0], [0], [1], [0, 0, 1, 1], [], []>} : vector<16x32xbf16>, vector<32x64xbf16>, vector<16x64xf32> -> vector<16x64xf32>
    %c0_13 = arith.constant 0 : index
    %c0_14 = arith.constant 0 : index
    %15 = vector.load %arg7[%c0_13, %c0_14] : memref<1x64xf32, #tpu.memory_space<vmem>>, vector<1x64xf32>
    %16 = vector.broadcast %15 : vector<1x64xf32> to vector<16x64xf32>
    %17 = arith.addf %14, %16 : vector<16x64xf32>
    %18 = vector.extract_strided_slice %17 {offsets = [0, 0], sizes = [16, 32], strides = [1, 1]} : vector<16x64xf32> to vector<16x32xf32>
    %19 = math.tanh %18 : vector<16x32xf32>
    %20 = vector.extract_strided_slice %17 {offsets = [0, 32], sizes = [16, 32], strides = [1, 1]} : vector<16x64xf32> to vector<16x32xf32>
    %21 = arith.negf %20 : vector<16x32xf32>
    %22 = math.exp %21 : vector<16x32xf32>
    %cst_15 = arith.constant 1.000000e+00 : f32
    %23 = vector.broadcast %cst_15 : f32 to vector<16x32xf32>
    %24 = arith.addf %23, %22 : vector<16x32xf32>
    %25 = arith.divf %23, %24 : vector<16x32xf32>
    %26 = arith.mulf %19, %25 : vector<16x32xf32>
    %c0_16 = arith.constant 0 : index
    %c0_17 = arith.constant 0 : index
    %27 = vector.load %arg8[%c0_16, %c0_17] : memref<1x32xf32, #tpu.memory_space<vmem>>, vector<1x32xf32>
    %28 = vector.broadcast %27 : vector<1x32xf32> to vector<16x32xf32>
    %29 = arith.mulf %26, %28 : vector<16x32xf32>
    %cst_18 = arith.constant dense<0.000000e+00> : vector<16xf32>
    %30 = vector.multi_reduction <add>, %29, %cst_18 [1] : vector<16x32xf32> to vector<16xf32>
    %31 = vector.shape_cast %30 : vector<16xf32> to vector<16x1xf32>
    %cst_19 = arith.constant 0.000000e+00 : f32
    %32 = vector.broadcast %cst_19 : f32 to vector<16x1xf32>
    %33 = arith.cmpf ole, %6, %32 : vector<16x1xf32>
    %c16_i32 = arith.constant 16 : i32
    %34 = arith.muli %arg1, %c16_i32 : i32
    %35 = tpu.iota {dimensions = array<i32: 0>} : vector<16x1xi32>
    %36 = vector.broadcast %34 : i32 to vector<16x1xi32>
    %37 = arith.addi %36, %35 : vector<16x1xi32>
    %c40_i32 = arith.constant 40 : i32
    %38 = vector.broadcast %c40_i32 : i32 to vector<16x1xi32>
    %39 = arith.cmpi slt, %37, %38 : vector<16x1xi32>
    %40 = arith.andi %33, %39 : vector<16x1xi1>
    %cst_20 = arith.constant 0xFF800000 : f32
    %41 = vector.broadcast %cst_20 : f32 to vector<16x1xf32>
    %42 = arith.select %40, %31, %41 : vector<16x1xi1>, vector<16x1xf32>
    %c0_21 = arith.constant 0 : index
    %c0_22 = arith.constant 0 : index
    %43 = vector.load %arg10[%c0_21, %c0_22] : memref<1x1xf32, #tpu.memory_space<vmem>>, vector<1x1xf32>
    %cst_23 = arith.constant dense<0xFF800000> : vector<1xf32>
    %44 = vector.multi_reduction <maximumf>, %42, %cst_23 [0] : vector<16x1xf32> to vector<1xf32>
    %45 = vector.shape_cast %44 : vector<1xf32> to vector<1x1xf32>
    %46 = arith.maximumf %43, %45 : vector<1x1xf32>
    %cst_24 = arith.constant 0xFF800000 : f32
    %47 = vector.broadcast %cst_24 : f32 to vector<1x1xf32>
    %48 = arith.cmpf oeq, %46, %47 : vector<1x1xf32>
    %cst_25 = arith.constant 0.000000e+00 : f32
    %49 = vector.broadcast %cst_25 : f32 to vector<1x1xf32>
    %50 = arith.select %48, %49, %46 : vector<1x1xi1>, vector<1x1xf32>
    %51 = arith.subf %43, %50 : vector<1x1xf32>
    %52 = math.exp %51 : vector<1x1xf32>
    %53 = vector.broadcast %50 : vector<1x1xf32> to vector<16x1xf32>
    %54 = arith.subf %42, %53 : vector<16x1xf32>
    %55 = math.exp %54 : vector<16x1xf32>
    %cst_26 = arith.constant 0.000000e+00 : f32
    %56 = vector.shape_cast %40 : vector<16x1xi1> to vector<16x1xi1>
    %57 = vector.broadcast %56 : vector<16x1xi1> to vector<16x32xi1>
    %58 = vector.broadcast %cst_26 : f32 to vector<16x32xf32>
    %59 = arith.select %57, %11, %58 : vector<16x32xi1>, vector<16x32xf32>
    %c0_27 = arith.constant 0 : index
    %c0_28 = arith.constant 0 : index
    %60 = vector.load %arg11[%c0_27, %c0_28] : memref<1x1xf32, #tpu.memory_space<vmem>>, vector<1x1xf32>
    %61 = arith.mulf %52, %60 : vector<1x1xf32>
    %cst_29 = arith.constant dense<0.000000e+00> : vector<1xf32>
    %62 = vector.multi_reduction <add>, %55, %cst_29 [0] : vector<16x1xf32> to vector<1xf32>
    %63 = vector.shape_cast %62 : vector<1xf32> to vector<1x1xf32>
    %64 = arith.addf %61, %63 : vector<1x1xf32>
    %c0_30 = arith.constant 0 : index
    %c0_31 = arith.constant 0 : index
    %65 = vector.load %arg11[%c0_30, %c0_31] : memref<1x1xf32, #tpu.memory_space<vmem>>, vector<1x1xf32>
    tpu.vector_store %arg11[%c0_30, %c0_31], %64 {strides = array<i32>} : memref<1x1xf32, #tpu.memory_space<vmem>>, vector<1x1xf32>,
    %cst_32 = arith.constant dense<0.000000e+00> : vector<1x32xf32>
    %66 = tpu.matmul %55, %59, %cst_32 {dimension_numbers = #tpu.dot_dimension_numbers<[0], [0], [1], [1], [0, 1, 1, 1], [], []>} : vector<16x1xf32>, vector<16x32xf32>, vector<1x32xf32> -> vector<1x32xf32>
    %c0_33 = arith.constant 0 : index
    %c0_34 = arith.constant 0 : index
    %67 = vector.load %arg12[%c0_33, %c0_34] : memref<1x32xf32, #tpu.memory_space<vmem>>, vector<1x32xf32>
    %68 = vector.broadcast %52 : vector<1x1xf32> to vector<1x32xf32>
    %69 = arith.mulf %68, %67 : vector<1x32xf32>
    %70 = arith.addf %69, %66 : vector<1x32xf32>
    %c0_35 = arith.constant 0 : index
    %c0_36 = arith.constant 0 : index
    %71 = vector.load %arg12[%c0_35, %c0_36] : memref<1x32xf32, #tpu.memory_space<vmem>>, vector<1x32xf32>
    tpu.vector_store %arg12[%c0_35, %c0_36], %70 {strides = array<i32>} : memref<1x32xf32, #tpu.memory_space<vmem>>, vector<1x32xf32>,
    %c0_37 = arith.constant 0 : index
    %c0_38 = arith.constant 0 : index
    %72 = vector.load %arg10[%c0_37, %c0_38] : memref<1x1xf32, #tpu.memory_space<vmem>>, vector<1x1xf32>
    tpu.vector_store %arg10[%c0_37, %c0_38], %46 {strides = array<i32>} : memref<1x1xf32, #tpu.memory_space<vmem>>, vector<1x1xf32>,
    %c2_i32 = arith.constant 2 : i32
    %73 = arith.cmpi eq, %arg1, %c2_i32 : i32
    %74 = arith.extui %73 : i1 to i32
    %c0_i32_39 = arith.constant 0 : i32
    %75 = arith.cmpi ne, %74, %c0_i32_39 : i32
    scf.if %75 {
      %c0_40 = arith.constant 0 : index
      %c0_41 = arith.constant 0 : index
      %76 = vector.load %arg12[%c0_40, %c0_41] : memref<1x32xf32, #tpu.memory_space<vmem>>, vector<1x32xf32>
      %c0_42 = arith.constant 0 : index
      %c0_43 = arith.constant 0 : index
      %77 = vector.load %arg11[%c0_42, %c0_43] : memref<1x1xf32, #tpu.memory_space<vmem>>, vector<1x1xf32>
      %78 = vector.broadcast %77 : vector<1x1xf32> to vector<1x32xf32>
      %79 = arith.divf %76, %78 : vector<1x32xf32>
      %c0_44 = arith.constant 0 : index
      %c0_45 = arith.constant 0 : index
      %c0_46 = arith.constant 0 : index
      %80 = vector.load %arg9[%c0_44, %c0_45, %c0_46] : memref<1x1x32xf32, #tpu.memory_space<vmem>>, vector<1x1x32xf32>
      %81 = vector.shape_cast %80 : vector<1x1x32xf32> to vector<1x32xf32>
      %82 = vector.shape_cast %79 : vector<1x32xf32> to vector<1x1x32xf32>
      tpu.vector_store %arg9[%c0_44, %c0_45, %c0_46], %82 {strides = array<i32>} : memref<1x1x32xf32, #tpu.memory_space<vmem>>, vector<1x1x32xf32>,
    } else {
    }
    return
  }
  func.func @transform_0(%arg0: i32, %arg1: i32) -> (i32, i32, i32) {
    %c0_i32 = arith.constant 0 : i32
    %c0_i32_0 = arith.constant 0 : i32
    return %arg0, %arg1, %c0_i32 : i32, i32, i32
  }
  func.func @transform_1(%arg0: i32, %arg1: i32) -> (i32, i32, i32) {
    %c0_i32 = arith.constant 0 : i32
    %c0_i32_0 = arith.constant 0 : i32
    return %arg0, %arg1, %c0_i32 : i32, i32, i32
  }
  func.func @transform_2(%arg0: i32, %arg1: i32) -> (i32, i32) {
    %c0_i32 = arith.constant 0 : i32
    %c0_i32_0 = arith.constant 0 : i32
    %c0_i32_1 = arith.constant 0 : i32
    return %c0_i32, %c0_i32_0 : i32, i32
  }
  func.func @transform_3(%arg0: i32, %arg1: i32) -> (i32, i32) {
    %c0_i32 = arith.constant 0 : i32
    %c0_i32_0 = arith.constant 0 : i32
    %c0_i32_1 = arith.constant 0 : i32
    return %c0_i32, %c0_i32_0 : i32, i32
  }
  func.func @transform_4(%arg0: i32, %arg1: i32) -> (i32, i32) {
    %c0_i32 = arith.constant 0 : i32
    %c0_i32_0 = arith.constant 0 : i32
    %c0_i32_1 = arith.constant 0 : i32
    return %c0_i32, %c0_i32_0 : i32, i32
  }
  func.func @transform_5(%arg0: i32, %arg1: i32) -> (i32, i32) {
    %c0_i32 = arith.constant 0 : i32
    %c0_i32_0 = arith.constant 0 : i32
    %c0_i32_1 = arith.constant 0 : i32
    return %c0_i32, %c0_i32_0 : i32, i32
  }
  func.func @transform_6(%arg0: i32, %arg1: i32) -> (i32, i32) {
    %c0_i32 = arith.constant 0 : i32
    %c0_i32_0 = arith.constant 0 : i32
    %c0_i32_1 = arith.constant 0 : i32
    return %c0_i32, %c0_i32_0 : i32, i32
  }
  func.func @transform_7(%arg0: i32, %arg1: i32) -> (i32, i32, i32) {
    %c0_i32 = arith.constant 0 : i32
    %c0_i32_0 = arith.constant 0 : i32
    %c0_i32_1 = arith.constant 0 : i32
    return %arg0, %c0_i32, %c0_i32_0 : i32, i32, i32
  }
}

</mosaic_0001>

<bundles_post_ra>
// kernel: tpu_custom_call.1
= control target key start
LH: loop header
LB: loop body
LE: loop exit
PB: predicated region body
PF: predicated region fallthrough
CT: control target
= control target key end

     0   :  { %12 = vsyncpa [#allocation6], 0  ;;  %s1421_s0 = inlined_call_operand.vmem [shape: bf16[2,40,35], index: 0, kind: input, shape index: {}]   ;;  %s1422_s1 = inlined_call_operand.vmem [shape: f32[2,40,1], index: 1, kind: input, shape index: {}]   ;;  %s1423_s2 = inlined_call_operand.vmem [shape: bf16[35,32], index: 2, kind: input, shape index: {}]   ;;  %s1424_s3 = inlined_call_operand.vmem [shape: f32[1,32], index: 3, kind: input, shape index: {}]   ;;  %s1425_s4 = inlined_call_operand.vmem [shape: bf16[32,64], index: 4, kind: input, shape index: {}]   ;;  %s1426_s5 = inlined_call_operand.vmem [shape: f32[1,64], index: 5, kind: input, shape index: {}]   ;;  %s1427_s6 = inlined_call_operand.vmem [shape: f32[1,32], index: 6, kind: input, shape index: {}]   ;;  %s1428_s7 = inlined_call_operand.hbm [shape: f32[2,1,32], index: 7, kind: output, shape index: {}]  }
   0x1   :  { %14 = vsyncpa [#allocation6 + $0x1], 0  ;;  %s1216_s24 = smov 0   ;;  %s1218_s25 = smov 0  }
   0x2   :  { %s1220_s26 = smov 0   ;;  %s1222_s27 = smov 0  }
   0x3   :  { %s1224_s28 = smov 0   ;;  %s1226_s29 = smov 0  }
   0x4   :  { %s1228_s30 = smov 0   ;;  %s1230_s8 = smov 0  }
   0x5 LB: > { %1432 = sst [smem:[#allocation8_spill]] %s1157_s29  ;;  %s898_s9 = sadd.s32 4294967295, %s1165_s8   ;;  %s1165_s8 = sphi %s1230_s8, %s20_s8   ;;  %s1161_s30 = sphi %s1228_s30, %s1443_s30   ;;  %s1157_s29 = sphi %s1226_s29, %s1442_s29   ;;  %s1153_s28 = sphi %s1224_s28, %s1441_s28   ;;  %s1149_s27 = sphi %s1222_s27, %s1440_s27   ;;  %s1145_s26 = sphi %s1220_s26, %s1446_s26   ;;  %s1141_s25 = sphi %s1218_s25, %s1445_s25   ;;  %s1137_s24 = sphi %s1216_s24, %s1444_s24  }
   0x6   : > { %1433 = sst [smem:[#allocation9_spill]] %s1161_s30  ;;  %s899_s10 = sadd.s32 4294967294, %s1165_s8  }
   0x7   : > { %s29_s11 = sadd.s32 1, %s1157_s29  ;;  %s32_s12 = sadd.s32 1, %s1161_s30 }
   0x8   : > { %p30_p0 = scmp.ge.s32.totalorder %s29_s11, 3  ;;  %p210_p1 = scmp.ne.s32.totalorder %s1145_s26, %s1141_s25 }
   0x9   : > { %p211_p2 = scmp.eq.s32.totalorder %s898_s9, 5  ;;  %p216_p4 = scmp.ne.s32.totalorder %s1141_s25, %s1137_s24 }
   0xa   : > { %s1448_s11 = smov (%p30_p0, %s29_s11), 0  ;;  %s1450_s12 = smov (!%p30_p0, %s32_s12), %s1161_s30 }
   0xb   : > { %1434 = sst [smem:[#allocation10_spill]] %s1448_s11  ;;  %p1265_p3 = por %p211_p2, %p210_p1 }
   0xc   : > { %p34_p5 = scmp.ge.s32.totalorder %s1450_s12, 2  ;;  %p217_p6 = scmp.eq.s32.totalorder %s899_s10, 5 }
   0xd   : > { %p902_p7 = scmp.ge.s32.totalorder %s1165_s8, 1  ;;  %p292_p8 = scmp.lt.s32.totalorder %s1165_s8, 7 }
   0xe   : > { %s1452_s12 = smov (%p34_p5, %s1450_s12), 0  ;;  %p1275_p9 = por %p217_p6, %p216_p4 }
   0xf   : > { %1436 = sst [smem:[#allocation11_spill]] %s1452_s12  ;;  %p293_p10 = pnand %p902_p7, %p292_p8 }
  0x10   : > { %s197_s15 = ssub.s32 %s1161_s30, %s1452_s12  ;;  %s200_s16 = sadd.s32 1, %s1145_s26 }
  0x11   : > { %p198_p11 = scmp.eq.s32.totalorder %s197_s15, 0  ;;  %296 = sbr.rel (%p293_p10) target bundleno = 1269 (0x4f5), region = 48 }
  0x12   : > { %s342_s18 = sand.u32 (!%p293_p10), 1, %s1141_s25   ;;  %s903_s19 = sshll.u32 (!%p293_p10), %s1149_s27, 1 }
  0x13   : > { %s1283_s17 = scalar_select %p198_p11, %s1145_s26, %s200_s16  }
  0x14   : > { %p349_p12 = scmp.lt.s32.totalorder (!%p293_p10), %s1153_s28, 1  ;;  %p351_p13 = scmp.lt.s32.totalorder (!%p293_p10), %s903_s19, 4 }
  0x15   : > { %s1301_s29 = scalar_lea.vmem (!%p293_p10), [#allocation5], %s342_s18  ;;  %p907_p0 = scmp.ne.s32.totalorder (!%p293_p10), %s1149_s27, 0 }
  0x16   : > { %s350_s20 = scalar_select %p349_p12, %s1153_s28, 1 }
  0x17   : > { %s1454_s19 = smov (!%p351_p13, %s903_s19), 4 }
  0x18   : > { %s964_s21 = smul.u32 5, %s350_s20 }
  0x19   : > { %384 = sbr.rel (%p907_p0) target bundleno = 33 (0x21), region = 52 }
  0x1a   : > { %s354_s22 = sadd.s32 %s964_s21, %s1454_s19 }
  0x1b   : > { %s904_s23 = sshll.u32 %s354_s22, 2  ;;  %s906_s9 = sshll.u32 %s354_s22, 3 }
  0x1c   : > { %s1292_s16 = scalar_lea.vmem %s1421_s0, %s904_s23  ;;  %s1297_s30 = scalar_lea.vmem %s1422_s1, %s906_s9 }
  0x1e   : > { %vm385_vm0 = vcmask 0   ;;  %vm388_vm1 = vcmask 253952   ;;  %v1167_v0 = vmov -inf   ;;  %v1168_v1 = vmov 0.0  }
  0x1f   : > { %386 = vst.msk [vmem:[#allocation2] sm:$0x1] %vm385_vm0, %v1167_v0  ;;  %387 = vst.msk [vmem:[#allocation3] sm:$0x1] %vm385_vm0, %v1168_v1 }
  0x20   : > { %389 = vst.msk [vmem:[#allocation4] sm:$0x1] %vm388_vm1, %v1168_v1 }
  0x21 PF: > { %v1046_v2 = vld [vmem:[%s1423_s2 + $0x10] ss:$0 sps:$4 sm:$0x33]   ;;  %v1169_v3 = vmov 0.0   ;;  %vm430_vm2 = vcmask 1040384   ;;  %vm431_vm3 = vcmask 1041408   ;;  %v589_v32 = vlaneseq }
  0x22   : > { %939 = vmatprep.subr.bf16.mxu0 %v1169_v3  ;;  %949 = vmatprep.subr.bf16.mxu1 %v1169_v3  ;;  %v1170_v4 = vmov 65535   ;;  %vm1171_vm4 = vmmov 0   ;;  %v1047_v8 = vld [vmem:[%s1423_s2 + $0x8] sm:$0xff]   ;;  %v1048_v9 = vld [vmem:[%s1423_s2] sm:$0xff]   ;;  %vm426_vm5 = vcmask 285696   ;;  %vm502_vm6 = vcmask 261120  }
  0x23   : > { %v432_v5 = vsel %vm430_vm2, 4294967295, %v1170_v4  ;;  %945 = vmatprep.mubr.msk.bf16.mxu0 %vm1171_vm4, %v1169_v3  ;;  %953 = vmatprep.mubr.msk.bf16.mxu1 %vm1171_vm4, %v1169_v3  ;;  %v1049_v10 = vld [vmem:[%s1292_s16] sm:$0xff]   ;;  %v1050_v11 = vld [vmem:[%s1425_s4 + $0x8] sm:$0xff]   ;;  %v1172_v21 = vmov 0   ;;  %v590_v35 = vshrl.u32 %v589_v32, 7  ;;  %s921_s12 = sshll.u32 %s1149_s27, 4 }
  0x24   : > { %v433_v6 = vsel %vm431_vm3, %v432_v5, 0  ;;  %950 = vmatpush3.bf16.msra.mxu1 %v1050_v11  ;;  %v1051_v12 = vld [vmem:[%s1425_s4] sm:$0xff]   ;;  %1044 = vset.pattern.permute.xlu0 %v1172_v21  ;;  %v592_v38 = vstv %s921_s12  ;;  %v393_v40 = vld [vmem:[%s1297_s30 + $0x8] sm:$0xff]  ;;  %s1173_s21 = smov 96   ;;  %vm602_vm14 = vcmask 7168   ;;  %vm654_vm0 = vcmask 0  }
  0x25   : > { %v435_v7 = vand.u32 %v1046_v2, %v433_v6  ;;  %951 = vmatprep.subr.bf16.mxu1 %v1169_v3  ;;  %v908_v14 = vld [vmem:[%s1424_s3] ss:$0 sm:$0xff]  ;;  %1045 = vset.pattern.permute.xlu1 %v1172_v21  ;;  %v591_v37 = vadd.s32 8, %v590_v35  ;;  %vm587_vm7 = vcmp.le.f32.partialorder %v393_v40, 0.0  ;;  %v593_v56 = vadd.s32 %v592_v38, %v590_v35  ;;  %p925_p1 = scmp.ne.s32.totalorder %s1149_s27, 2 }
  0x26   : > { %v914_v22 = vld [vmem:[%s1426_s5] ss:$0 sm:$0xff]  ;;  %v621_v11 = vsub.s32 0, %v590_v35  ;;  %vm688_vm2 = vcmask 130048   ;;  %vm774_vm3 = vcmask 253952  }
  0x27   : > { %940 = vmatpush3.bf16.msra.mxu0 %v435_v7  ;;  %v594_v39 = vadd.s32 %v592_v38, %v591_v37  ;;  %v920_v47 = vld [vmem:[%s1427_s6] ss:$0 sm:$0xff]  ;;  %vm595_vm12 = vcmp.lt.s32.totalorder %v593_v56, 40 }
  0x28   : > { %941 = vmatprep.subr.bf16.mxu0 %v1169_v3  ;;  %952 = vmatpush3.bf16.msra.mxu1 %v1051_v12  ;;  %v392_v57 = vld [vmem:[%s1297_s30] sm:$0xff] }
  0x29   : > { %957 = vmatprep.subr.mxu1 %v1169_v3  ;;  %vm596_vm8 = vcmp.lt.s32.totalorder %v594_v39, 40  ;;  %vm586_vm11 = vcmp.le.f32.partialorder %v392_v57, 0.0  ;;  %v762_v39 = vld [vmem:[#allocation4] sm:$0x1] }
  0x2a   : > { %vm1347_vm9 = vmand %vm587_vm7, %vm596_vm8 }
  0x2b   : > { %942 = vmatpush3.bf16.msra.mxu0 %v1047_v8  ;;  %v631_v44 = vsel %vm1347_vm9, 1, %v1172_v21  ;;  %vm597_vm13 = vmand %vm586_vm11, %vm595_vm12 }
  0x2c   : > { %943 = vmatprep.subr.bf16.mxu0 %v1169_v3  ;;  %v630_v59 = vsel %vm597_vm13, 1, %v1172_v21 }
  0x2f   : > { %944 = vmatpush3.bf16.msra.mxu0 %v1048_v9  ;;  %v601_v9 = vld [vmem:[#allocation2] sm:$0x1] }
  0x32   : > { %946 = vmatmul.mubr.msk.bf16.vlgmr.msra.gmra.mxu0 %vm426_vm5, %v1049_v10 }
  0xf2   : > { %v471_v13 = vpop.f32.mrf.mxu0 }
  0xf3   : > { %v1333_v17 = vadd.f32 %v908_v14, %v471_v13 }
  0xf4   : > { %v947_v15 = vpop.f32.mrf.mxu0 }
  0xf6   : > { %v474_v16 = vpop.f32.mrf.mxu0 }
  0xf7   : > { %v1335_v18 = vadd.f32 %v908_v14, %v474_v16 }
  0xf8   : > { %v948_v19 = vpop.f32.mrf.mxu0 }
  0xf9   : > { %v478_v20 = vpack.c.bf16 %v1335_v18, %v1333_v17 }
  0xfb   : > { %954 = vmatmul.mubr.msk.bf16.vlgmr.msra.gmra.mxu1 %vm502_vm6, %v478_v20 }
  0xfc   : > { %961 = vmatprep.mubr.msk.f32.mxu1 %vm1171_vm4, %v1169_v3 }
 0x1bb   : > { %v540_v23 = vpop.f32.mrf.mxu1 }
 0x1bc   : > { %v541_v24 = vadd.f32 %v914_v22, %v540_v23 }
 0x1bd   : > { %v955_v25 = vpop.f32.mrf.mxu1 }
 0x1be   : > { %v918_v26 = vmul.f32 -1.442695, %v541_v24 }
 0x1bf   : > { %v543_v27 = vpop.f32.mrf.mxu1 }
 0x1c0   : > { %1052 = vpow2.f32 %v918_v26  ;;  %v544_v28 = vadd.f32 %v914_v22, %v543_v27 }
 0x1c1   : > { %v956_v29 = vpop.f32.mrf.mxu1 }
 0x1c2   : > { %v919_v30 = vmul.f32 -1.442695, %v544_v28 }
 0x1c4   : > { %1054 = vpow2.f32 %v919_v30 }
 0x1cd   : > { %v1053_v31 = vpop.eup %1052 }
 0x1ce   : > { %v555_v33 = vadd.f32 1.0, %v1053_v31  ;;  %v642_v31 = vld [vmem:[#allocation3] sm:$0x1] }
 0x1d0   : > { %1056 = vrcp.f32 %v555_v33 }
 0x1d1   : > { %v1055_v34 = vpop.eup %1054 }
 0x1d2   : > { %v556_v36 = vadd.f32 1.0, %v1055_v34 }
 0x1d4   : > { %1058 = vrcp.f32 %v556_v36 }
 0x1d5   : > { %1060 = vtanh.f32 %v541_v24 }
 0x1d6   : > { %1062 = vtanh.f32 %v544_v28 }
 0x1dd   : > { %v1057_v41 = vpop.eup %1056 }
 0x1de   : > { %563 = vrot.lane.b32.xlu0 %v1057_v41, %s1173_s21 }
 0x1e1   : > { %v1059_v43 = vpop.eup %1058 }
 0x1e2   : > { %565 = vrot.lane.b32.xlu0 %v1059_v43, %s1173_s21  ;;  %v1061_v45 = vpop.eup %1060 }
 0x1e3   : > { %v1063_v50 = vpop.eup %1062 }
 0x1e6   : > { %636 = vperm.xlu0 %1044, %v631_v44  }
 0x250   : > { %v564_v46 = vpop.permute.xlu0 %563 }
 0x251   : > { %v569_v48 = vmul.f32 %v1061_v45, %v564_v46 }
 0x253   : > { %v578_v49 = vmul.f32 %v920_v47, %v569_v48 }
 0x254   : > { %v566_v51 = vpop.permute.xlu0 %565 }
 0x255   : > { %v570_v52 = vmul.f32 %v1063_v50, %v566_v51  ;;  %v580_v53 = vsel %vm502_vm6, %v578_v49, 0.0 }
 0x256   : > { %581 = vadd.xlane.f32.xlu1 %v580_v53 }
 0x257   : > { %v579_v54 = vmul.f32 %v920_v47, %v570_v52 }
 0x259   : > { %v583_v55 = vsel %vm502_vm6, %v579_v54, 0.0 }
 0x25a   : > { %584 = vadd.xlane.f32.xlu1 %v583_v55 }
 0x261   : > { %v637_v58 = vpop.permute.xlu0 %636 }
 0x262   : > { %vm639_vm10 = vcmp.eq.s32.totalorder %v637_v58, 1 }
 0x263   : > { %958 = vmatpush3.msk.msra.mxu1 %vm639_vm10, %v1335_v18 }
 0x264   : > { %959 = vmatprep.subr.mxu1 %v1169_v3 }
 0x26b   : > { %633 = vperm.xlu1 %1045, %v630_v59  }
 0x2df   : > { %v582_v60 = vpop.xlane.xlu1 %581 }
 0x2e0   : > { %v599_v61 = vsel %vm597_vm13, %v582_v60, -inf }
 0x2e1   : > { %v603_v0 = vsel %vm602_vm14, %v599_v61, -inf }
 0x2e3   : > { %v585_v62 = vpop.xlane.xlu1 %584 }
 0x2e4   : > { %v600_v63 = vsel %vm1347_vm9, %v585_v62, -inf }
 0x2e5   : > { %v604_v1 = vsel %vm602_vm14, %v600_v63, -inf }
 0x2e6   : > { %v605_v2 = vmax.f32 %v603_v0, %v604_v1 }
 0x2e7   : > { %v634_v4 = vpop.permute.xlu1 %633 }
 0x2e8   : > { %v606_v5 = vrot.slane %v605_v2, 4  ;;  %vm638_vm15 = vcmp.eq.s32.totalorder %v634_v4, 1 }
 0x2e9   : > { %960 = vmatpush3.msk.msra.mxu1 %vm638_vm15, %v1333_v17 }
 0x2ea   : > { %v607_v3 = vmax.f32 %v605_v2, %v606_v5 }
 0x2ec   : > { %v608_v6 = vrot.slane %v607_v3, 2 }
 0x2ee   : > { %v609_v7 = vmax.f32 %v607_v3, %v608_v6 }
 0x2f0   : > { %v610_v8 = vrot.slane %v609_v7, 1 }
 0x2f2   : > { %v611_v10 = vmax.f32 %v609_v7, %v610_v8 }
 0x2f4   : > { %v612_v12 = vmax.f32 %v601_v9, %v611_v10 }
 0x2f6   : > { %vm613_vm1 = vcmp.eq.f32.partialorder %v612_v12, -inf  ;;  %776 = vst.msk [vmem:[#allocation2] sm:$0x1] %vm654_vm0, %v612_v12 }
 0x2f7   : > { %v614_v13 = vsel %vm613_vm1, 0.0, %v612_v12 }
 0x2f8   : > { %v615_v14 = vsub.f32 %v601_v9, %v614_v13  ;;  %v622_v15 = vrot.slane %v614_v13, %v621_v11 }
 0x2fa   : > { %v616_v16 = vmul.f32 1.442695, %v615_v14  ;;  %v624_v18 = vsub.f32 %v599_v61, %v622_v15  ;;  %v625_v19 = vsub.f32 %v600_v63, %v622_v15 }
 0x2fc   : > { %1064 = vpow2.f32 %v616_v16  ;;  %v626_v17 = vmul.f32 1.442695, %v624_v18  ;;  %v628_v20 = vmul.f32 1.442695, %v625_v19 }
 0x2fe   : > { %1066 = vpow2.f32 %v626_v17 }
 0x2ff   : > { %1068 = vpow2.f32 %v628_v20 }
 0x309   : > { %v1065_v21 = vpop.eup %1064 }
 0x30a   : > { %765 = vperm.xlu1 %1045, %v1065_v21   ;;  %v643_v33 = vmul.f32 %v1065_v21, %v642_v31 }
 0x30b   : > { %v1067_v22 = vpop.eup %1066 }
 0x30c   : > { %v1069_v23 = vpop.eup %1068  ;;  %v644_v24 = vsel %vm602_vm14, %v1067_v22, 0.0  ;;  %656 = vxpose.xlu0.b32.start [1/2] (short) (narrow) %v1067_v22, 8 }
 0x30d   : > { %v645_v25 = vsel %vm602_vm14, %v1069_v23, 0.0 }
 0x30e   : > { %v646_v26 = vadd.f32 %v645_v25, %v644_v24 }
 0x310   : > { %v647_v27 = vrot.slane %v646_v26, 4  ;;  %657 = vxpose.xlu0.b32.end [2/2] (short) (narrow) %v1069_v23, 8 }
 0x312   : > { %v648_v28 = vadd.f32 %v647_v27, %v646_v26 }
 0x314   : > { %v649_v29 = vrot.slane %v648_v28, 2 }
 0x316   : > { %v650_v30 = vadd.f32 %v649_v29, %v648_v28 }
 0x318   : > { %v651_v32 = vrot.slane %v650_v30, 1 }
 0x31a   : > { %v652_v34 = vadd.f32 %v651_v32, %v650_v30 }
 0x31c   : > { %v653_v35 = vadd.f32 %v652_v34, %v643_v33 }
 0x31e   : > { %655 = vst.msk [vmem:[#allocation3] sm:$0x1] %vm654_vm0, %v653_v35 }
 0x385   : > { %v766_v37 = vpop.permute.xlu1 %765 }
 0x386   : > { %v771_v38 = vrot.slane %v766_v37, %v621_v11 }
 0x388   : > { %v672_v36 = vpop.trf.xlu0  ;;  %v772_v40 = vmul.f32 %v771_v38, %v762_v39 }
 0x389   : > { %962 = vmatmul.mubr.msk.f32.vlgmr.msra.gmra.mxu1 %vm688_vm2, %v672_v36 }
 0x448   : > { %780 = sbr.rel (%p925_p1) target bundleno = 1246 (0x4de), region = 56 }
 0x449   : > { %v758_v41 = vpop.f32.mrf.mxu1 }
 0x44a   : > { %v773_v42 = vadd.f32 %v772_v40, %v758_v41 }
 0x44b   : > { %v963_v43 = vpop.f32.mrf.mxu1 }
 0x44c   : > { %775 = vst.msk [vmem:[#allocation4] sm:$0x1] %vm774_vm3, %v773_v42 }
 0x44d   : > { %v782_v44 = vld [vmem:[#allocation3] sm:$0x1]  ;;  %v1174_v45 = vmov 0  }
 0x44e   : > { %1070 = vset.pattern.permute.xlu0 %v1174_v45 }
 0x44f   : > { %785 = vperm.xlu0 %1070, %v782_v44  }
 0x453   : > { %v781_v48 = vld [vmem:[#allocation4] sm:$0x1] }
 0x4ca   : > { %v786_v46 = vpop.permute.xlu0 %785 }
 0x4cb   : > { %v791_v47 = vrot.slane %v786_v46, %v621_v11 }
 0x4cd   : > { %1071 = vrcp.f32 %v791_v47 }
 0x4da   : > { %v1072_v49 = vpop.eup %1071 }
 0x4db   : > { %v793_v50 = vmul.f32 %v1072_v49, %v781_v48 }
 0x4dd   : > { %794 = vst.msk [vmem:[%s1301_s29] sm:$0x1] %vm774_vm3, %v793_v50 }
 0x4de PF: > { %s926_s27 = sshll.u32 %s1153_s28, 4  ;;  %s808_s15 = sshll.u32 %s1301_s29, 4  ;;  %s809_s15 = int_to_ptr.vmem [resolvable:$true] %s808_s15 }
 0x4df   : > { %s806_s10 = scalar_lea.hbm %s1428_s7, %s926_s27  ;;  %s796_s19 = scalar_lea.sflag [#allocation6], %s342_s18 }
 0x4e0   : > { %s1073_s16 = scalar_lea.vmem %s809_s15, 16  ;;  %s1175_s20 = smov [#allocation5]  }
 0x4e1   : > { %p1074_p2 = scmp.ne.s32.totalorder %s809_s15, %s1073_s16  ;;  %s1077_s11 = sshll.u32 %s1175_s20, 4  ;;  %s1078_s11 = int_to_ptr.vmem [resolvable:$false] %s1077_s11 }
 0x4e2   : > { %s1079_s12 = scalar_lea.vmem %s1078_s11, 32  ;;  %p1080_p6 = scmp.lt.s32.totalorder %s809_s15, %s1078_s11 }
 0x4e3   : > { %p1075_p4 = pnand %p1074_p2, %p1265_p3  ;;  %p1081_p7 = scmp.lt.s32.totalorder %s1079_s12, %s1073_s16 }
 0x4e5   : > { %p1076_p5 = pneg %p1075_p4  ;;  %p1082_p8 = por %p1081_p7, %p1080_p6 }
 0x4e7   : > { %p1083_p10 = pnand %p1082_p8, %p1076_p5 }
 0x4e9   : > { %1086 = shalt.err (!%p1083_p10)
}
 0x4ea   : > { %s1087_s28 = scalar_lea.hbm %s806_s10, 16  ;;  %s1091_s21 = scalar_lea.hbm %s1428_s7, 32 }
 0x4eb   : > { %p1088_p11 = scmp.ne.s32.totalorder %s806_s10, %s1087_s28  ;;  %p1092_p0 = scmp.lt.s32.totalorder %s806_s10, %s1428_s7 }
 0x4ec   : > { %p1093_p1 = scmp.lt.s32.totalorder %s1091_s21, %s1087_s28 }
 0x4ed   : > { %p1089_p12 = pnand %p1088_p11, %p1265_p3 }
 0x4ee   : > { %p1094_p2 = por %p1093_p1, %p1092_p0 }
 0x4ef   : > { %p1090_p13 = pneg %p1089_p12 }
 0x4f1   : > { %p1095_p4 = pnand %p1094_p2, %p1090_p13 }
 0x4f3   : > { %1098 = shalt.err (!%p1095_p4)
}
 0x4f4   : > { %965 = dma.vmem_to_hbm [thread:$0]  (%p1265_p3), %s809_s15, 16, %s806_s10, %s796_s19  }
 0x4f5 PF: > { %p971_p5 = scmp.ge.s32.totalorder %s1165_s8, 2  ;;  %s820_s27 = sand.u32 1, %s1137_s24  }
 0x4f6   : > { %s821_s30 = scalar_lea.sflag [#allocation6], %s820_s27 }
 0x4f7   : > { %p968_p6 = pnand %p971_p5, %p1275_p9 }
 0x4f9   : > { %p969_p7 = pneg %p968_p6 }
 0x4fb   : > { %1132 = dma.done.wait (%p969_p7), %s821_s30, 16  }
 0x4fc   : > { %1134 = vsyncadd (%p969_p7), %s821_s30, 4294967280  ;;  %s20_s8 = sadd.s32 1, %s1165_s8   ;;  %s1440_s27 = sld [smem:[#allocation8_spill]] }
 0x4fd   : > { %p17_p8 = scmp.ge.s32.totalorder %s20_s8, 8   ;;  %s1441_s28 = sld [smem:[#allocation9_spill]] }
 0x4fe   : > { %s1442_s29 = sld [smem:[#allocation10_spill]]  ;;  %s1444_s24 = smov %s1141_s25 }
 0x4ff   : > { %s1443_s30 = sld [smem:[#allocation11_spill]]  ;;  %s1445_s25 = smov %s1145_s26 }
 0x500   : > { %s1446_s26 = smov %s1283_s17  ;;  %19 = sbr.rel (!%p17_p8) target bundleno = 5 (0x5), region = 94 }
 0x505   :  { %825 = vsyncpa [#allocation6], 1 }
 0x506   :  { %827 = vsyncpa [#allocation6 + $0x1], 1 }

</bundles_post_ra>
